<compile_context>
chip_gen: v7x
topology: tpu7x:2x2x1
jax: 0.10.0
libtpu: 0.0.40
codegen_flags: <defaults>
</compile_context>

<pallas_src>
import functools

import jax
import jax.numpy as jnp
from jax import lax
from jax.experimental import pallas as pl
from jax.experimental.pallas import tpu as pltpu

LRELU_SLOPE = 0.1

# (C_in, C_out, K, stride, padding) for QDiscriminatorS.convs
QCONV_CFG = (
    (4, 128, 15, 1, 7),
    (128, 128, 41, 2, 20),
    (128, 256, 41, 2, 20),
    (256, 512, 41, 4, 20),
    (512, 1024, 41, 4, 20),
    (1024, 1024, 5, 1, 2),
)


# ------------------------------ Pallas kernel ------------------------------ #

def _conv1d_kernel(x_ref, w_ref, b_ref, o_ref, *, taps, negative_slope):
    """One (C_out tile, batch) block of a strided 1-D convolution.

    x_ref: (1, S, C_in, Lp)   phase-split, zero-padded input (f32)
    w_ref: (K, CO_T, C_in)    weight taps (bf16 in HBM, upcast here)
    b_ref: (CO_T, 1)          bias (f32)
    o_ref: (1, CO_T, T_out)   output block
    """
    co_t = w_ref.shape[1]
    t_out = o_ref.shape[2]
    acc = jnp.zeros((co_t, t_out), jnp.float32)
    for k, (r, q) in enumerate(taps):
        # Static contiguous slice of the halo'd tile -- no roll / iota / mask work.
        xk = x_ref[0, r, :, q:q + t_out].astype(jnp.float32)      # (C_in, T_out)
        wk = w_ref[k].astype(jnp.float32)                          # (CO_T, C_in)
        if xk.shape[0] == 1:                                       # degenerate C_in=1
            acc = acc + wk * xk                                    # VPU outer product
        else:
            acc = acc + jnp.dot(wk, xk, preferred_element_type=jnp.float32)
    y = acc + b_ref[...]
    if negative_slope is not None:
        y = jnp.where(y > 0, y, jnp.float32(negative_slope) * y)
    o_ref[0] = y.astype(o_ref.dtype)


def _round_up(v, m):
    return (v + m - 1) // m * m


def _pick_cout_tile(c_out, c_in, k, w_itemsize, budget=10 * 1024 * 1024):
    """Largest multiple-of-8 power-of-two divisor of c_out whose weight block
    (double-buffered by the pipeline) stays within `budget` bytes."""
    if c_out <= 8 or c_out % 8 != 0:
        return c_out
    row_bytes = k * _round_up(c_in, 128) * w_itemsize
    best, cand = 8, 8
    while cand <= c_out:
        if c_out % cand == 0 and cand * row_bytes <= budget:
            best = cand
        cand *= 2
    return best


def _vmem_limit_bytes(s, c_in, lp, k, co_tile, t_out, w_itemsize):
    x_blk = s * _round_up(c_in, 8) * _round_up(lp, 128) * 4
    w_blk = k * _round_up(co_tile, 16) * _round_up(c_in, 128) * w_itemsize
    o_blk = _round_up(co_tile, 8) * _round_up(t_out, 128) * 4
    b_blk = _round_up(co_tile, 8) * 128 * 4
    est = 2 * (x_blk + w_blk + o_blk + b_blk) + 8 * 1024 * 1024
    # floor raises v5e's 16 MiB scoped default; ceiling stays under v7x's 64 MiB.
    return int(min(max(est, 32 * 1024 * 1024), 56 * 1024 * 1024))


def conv1d_pallas(x, w, b, *, stride, padding, negative_slope=None):
    """Strided zero-padded Conv1d (+ fused bias and optional leaky_relu).

    x: (B, C_in, T_in) f32;  w: (K, C_out, C_in);  b: (C_out,) f32.
    Returns (B, C_out, T_out), T_out = (T_in + 2*padding - K)//stride + 1.
    """
    B, C_in, T_in = x.shape
    K, C_out, C_in_w = w.shape
    assert C_in_w == C_in
    T_out = (T_in + 2 * padding - K) // stride + 1
    assert T_out >= 1, (T_in, padding, K, stride)

    # Zero-pad and split into `stride` phases so tap k becomes the static slice
    #   x_phase[k % stride][:, k//stride : k//stride + T_out].
    q_max = (K - 1) // stride
    lp = T_out + q_max
    total = stride * lp
    pad_right = total - padding - T_in
    x_pad = jnp.pad(x, ((0, 0), (0, 0), (padding, max(pad_right, 0))))
    x_pad = x_pad[:, :, :total]
    x_ph = x_pad.reshape(B, C_in, lp, stride).transpose(0, 3, 1, 2)   # (B,S,C_in,Lp)

    b_c = b.reshape(C_out, 1).astype(jnp.float32)

    w_itemsize = jnp.dtype(w.dtype).itemsize
    co_tile = _pick_cout_tile(C_out, C_in, K, w_itemsize)
    n_co = C_out // co_tile

    taps = tuple((k % stride, k // stride) for k in range(K))
    kernel = functools.partial(_conv1d_kernel, taps=taps,
                               negative_slope=negative_slope)

    return pl.pallas_call(
        kernel,
        out_shape=jax.ShapeDtypeStruct((B, C_out, T_out), x.dtype),
        grid_spec=pltpu.PrefetchScalarGridSpec(
            num_scalar_prefetch=0,
            # C_out tiles on the slow axis -> each weight block is DMA'd from HBM
            # exactly once per call; the (small) input re-streams per tile.
            grid=(n_co, B),
            in_specs=[
                pl.BlockSpec((1, stride, C_in, lp), lambda co, bb: (bb, 0, 0, 0)),
                pl.BlockSpec((K, co_tile, C_in), lambda co, bb: (0, co, 0)),
                pl.BlockSpec((co_tile, 1), lambda co, bb: (co, 0)),
            ],
            out_specs=pl.BlockSpec((1, co_tile, T_out), lambda co, bb: (bb, co, 0)),
        ),
        compiler_params=pltpu.CompilerParams(
            dimension_semantics=("parallel", "parallel"),
            vmem_limit_bytes=_vmem_limit_bytes(stride, C_in, lp, K, co_tile,
                                               T_out, w_itemsize),
        ),
    )(x_ph, w, b_c)


# ------------------------------ JAX reference ------------------------------ #

def conv1d_reference(x, w, b, *, stride, padding, negative_slope=None):
    y = lax.conv_general_dilated(
        x, w.astype(jnp.float32),
        window_strides=(stride,), padding=[(padding, padding)],
        dimension_numbers=("NCH", "HOI", "NCH"),
        precision=lax.Precision.HIGHEST)
    y = y + b.astype(jnp.float32)[None, :, None]
    if negative_slope is not None:
        y = jnp.where(y > 0, y, negative_slope * y)
    return y.astype(x.dtype)


# ----------------------------- module forward ------------------------------ #

def qdiscriminator_s(x, params, conv_fn):
    fmap = []
    w, bb = params["h2r"]
    x = conv_fn(x, w, bb, stride=1, padding=1)
    for w, bb, s, p in params["convs"]:
        x = conv_fn(x, w, bb, stride=s, padding=p, negative_slope=LRELU_SLOPE)
        fmap.append(x)
    w, bb = params["post"]
    x = conv_fn(x, w, bb, stride=1, padding=1)
    fmap.append(x)
    return x.reshape(x.shape[0], -1), fmap          # torch.flatten(x, 1, -1)


def qmultiscale_discriminator(y, y_hat, disc_params, pool_w, pool_b, conv_fn):
    y_d_rs, y_d_gs, fmap_rs, fmap_gs = [], [], [], []
    for i, p in enumerate(disc_params):
        if i != 0:
            # AvgPool1d(4, 2, padding=2) == conv with a 0.25*ones kernel.
            y = conv_fn(y, pool_w, pool_b, stride=2, padding=2)
            y_hat = conv_fn(y_hat, pool_w, pool_b, stride=2, padding=2)
        y_d_r, fmap_r = qdiscriminator_s(y, p, conv_fn)
        y_d_g, fmap_g = qdiscriminator_s(y_hat, p, conv_fn)
        y_d_rs.append(y_d_r); fmap_rs.append(fmap_r)
        y_d_gs.append(y_d_g); fmap_gs.append(fmap_g)
    return y_d_rs, y_d_gs, fmap_rs, fmap_gs


# --------------------------- parameter construction ------------------------ #

def quaternion_conv_weight(key, in_channels, out_channels, kernel_size):
    """Real Conv1d weight (K, C_out, C_in) of a QuaternionConv assembled via the
    Hamilton-product block layout used by quaternion_conv()."""
    assert in_channels % 4 == 0 and out_channels % 4 == 0
    so, si = out_channels // 4, in_channels // 4
    keys = jax.random.split(key, 4)
    scale = jnp.sqrt(2.0 / (in_channels * kernel_size))
    r, i, j, k = (scale * jax.random.normal(kk, (so, si, kernel_size), jnp.float32)
                  for kk in keys)
    row_r = jnp.concatenate([r, -i, -j, -k], axis=1)
    row_i = jnp.concatenate([i, r, -k, j], axis=1)
    row_j = jnp.concatenate([j, k, r, -i], axis=1)
    row_k = jnp.concatenate([k, -j, i, r], axis=1)
    w = jnp.concatenate([row_r, row_i, row_j, row_k], axis=0)      # (C_out, C_in, K)
    return jnp.transpose(w, (2, 0, 1))                             # (K, C_out, C_in)


def plain_conv_weight(key, in_channels, out_channels, kernel_size):
    scale = jnp.sqrt(2.0 / (in_channels * kernel_size))
    w = scale * jax.random.normal(key, (out_channels, in_channels, kernel_size),
                                  jnp.float32)
    return jnp.transpose(w, (2, 0, 1))                             # (K, C_out, C_in)


def make_qdiscriminator_params(key, wdtype=jnp.bfloat16):
    n = len(QCONV_CFG)
    keys = jax.random.split(key, n + 2)
    h2r_w = plain_conv_weight(keys[0], 1, 4, 3).astype(wdtype)
    h2r_b = jnp.zeros((4,), jnp.float32)
    convs = []
    for (c_in, c_out, k, s, p), kk in zip(QCONV_CFG, keys[1:1 + n]):
        kw, kb = jax.random.split(kk)
        w = quaternion_conv_weight(kw, c_in, c_out, k).astype(wdtype)
        b = 0.01 * jax.random.normal(kb, (c_out,), jnp.float32)
        convs.append((w, b, s, p))
    post_w = plain_conv_weight(keys[-1], 1024, 1, 3).astype(wdtype)
    post_b = jnp.zeros((1,), jnp.float32)
    return {"h2r": (h2r_w, h2r_b), "convs": convs, "post": (post_w, post_b)}


# ----------------------------------- main ----------------------------------- #

if __name__ == "__main__":
    B, T = 2, 128                      # small demo audio: (B, 1, T)
    root = jax.random.PRNGKey(0)
    ky, kyh, kparams = jax.random.split(root, 3)
    y = jax.random.normal(ky, (B, 1, T), jnp.float32)
    y_hat = jax.random.normal(kyh, (B, 1, T), jnp.float32)

    disc_keys = jax.random.split(kparams, 3)
    disc_params = [make_qdiscriminator_params(k) for k in disc_keys]
    pool_w = jnp.full((4, 1, 1), 0.25, jnp.float32)    # AvgPool1d(4,2,2) as a conv
    pool_b = jnp.zeros((1,), jnp.float32)

    out = qmultiscale_discriminator(y, y_hat, disc_params, pool_w, pool_b,
                                    conv1d_pallas)
    out = jax.block_until_ready(out)

    ref = qmultiscale_discriminator(y, y_hat, disc_params, pool_w, pool_b,
                                    conv1d_reference)

    y_d_rs, y_d_gs, fmap_rs, fmap_gs = out
    r_d_rs, r_d_gs, r_fm_rs, r_fm_gs = ref

    def _check(a, b, name):
        assert a.shape == b.shape, (name, a.shape, b.shape)
        assert jnp.allclose(a, b, atol=2e-3, rtol=2e-3), name

    for i in range(len(disc_params)):
        _check(y_d_rs[i], r_d_rs[i], f"y_d_r[{i}]")
        _check(y_d_gs[i], r_d_gs[i], f"y_d_g[{i}]")
        for j, (a, rb) in enumerate(zip(fmap_rs[i], r_fm_rs[i])):
            _check(a, rb, f"fmap_r[{i}][{j}]")
        for j, (a, rb) in enumerate(zip(fmap_gs[i], r_fm_gs[i])):
            _check(a, rb, f"fmap_g[{i}][{j}]")

    print("KERNEL_OK")
</pallas_src>

<mosaic_0001>
module attributes {stable_mosaic.version = 11 : i64} {
  func.func @_conv1d_kernel(%arg0: i32, %arg1: i32, %arg2: memref<1x1x1x130xf32, #tpu.memory_space<vmem>>, %arg3: memref<3x4x1xbf16, #tpu.memory_space<vmem>>, %arg4: memref<4x1xf32, #tpu.memory_space<vmem>>, %arg5: memref<1x4x128xf32, #tpu.memory_space<vmem>>) attributes {dimension_semantics = [#tpu.dimension_semantics<parallel>, #tpu.dimension_semantics<parallel>], iteration_bounds = array<i64: 1, 2>, scalar_prefetch = 0 : i64, scratch_operands = 0 : i64, tpu.core_type = #tpu.core_type<tc>, window_params = [{transform_indices = @transform_0, window_bounds = array<i64: 1, 1, 1, 130>}, {transform_indices = @transform_1, window_bounds = array<i64: 3, 4, 1>}, {transform_indices = @transform_2, window_bounds = array<i64: 4, 1>}, {transform_indices = @transform_3, window_bounds = array<i64: 1, 4, 128>}]} {
    %cst = arith.constant 0.000000e+00 : f32
    %0 = vector.broadcast %cst : f32 to vector<4x128xf32>
    %c0 = arith.constant 0 : index
    %c0_0 = arith.constant 0 : index
    %c0_1 = arith.constant 0 : index
    %c0_2 = arith.constant 0 : index
    %1 = vector.load %arg2[%c0, %c0_0, %c0_1, %c0_2] : memref<1x1x1x130xf32, #tpu.memory_space<vmem>>, vector<1x1x1x128xf32>
    %2 = vector.shape_cast %1 : vector<1x1x1x128xf32> to vector<1x128xf32>
    %c0_3 = arith.constant 0 : index
    %c0_4 = arith.constant 0 : index
    %c0_5 = arith.constant 0 : index
    %3 = vector.load %arg3[%c0_3, %c0_4, %c0_5] : memref<3x4x1xbf16, #tpu.memory_space<vmem>>, vector<1x4x1xbf16>
    %4 = vector.shape_cast %3 : vector<1x4x1xbf16> to vector<4x1xbf16>
    %5 = arith.extf %4 : vector<4x1xbf16> to vector<4x1xf32>
    %6 = vector.broadcast %5 : vector<4x1xf32> to vector<4x128xf32>
    %7 = vector.broadcast %2 : vector<1x128xf32> to vector<4x128xf32>
    %8 = arith.mulf %6, %7 : vector<4x128xf32>
    %9 = arith.addf %0, %8 : vector<4x128xf32>
    %c0_6 = arith.constant 0 : index
    %c0_7 = arith.constant 0 : index
    %c0_8 = arith.constant 0 : index
    %c1 = arith.constant 1 : index
    %10 = vector.load %arg2[%c0_6, %c0_7, %c0_8, %c1] : memref<1x1x1x130xf32, #tpu.memory_space<vmem>>, vector<1x1x1x128xf32>
    %11 = vector.shape_cast %10 : vector<1x1x1x128xf32> to vector<1x128xf32>
    %c1_9 = arith.constant 1 : index
    %c0_10 = arith.constant 0 : index
    %c0_11 = arith.constant 0 : index
    %12 = vector.load %arg3[%c1_9, %c0_10, %c0_11] : memref<3x4x1xbf16, #tpu.memory_space<vmem>>, vector<1x4x1xbf16>
    %13 = vector.shape_cast %12 : vector<1x4x1xbf16> to vector<4x1xbf16>
    %14 = arith.extf %13 : vector<4x1xbf16> to vector<4x1xf32>
    %15 = vector.broadcast %14 : vector<4x1xf32> to vector<4x128xf32>
    %16 = vector.broadcast %11 : vector<1x128xf32> to vector<4x128xf32>
    %17 = arith.mulf %15, %16 : vector<4x128xf32>
    %18 = arith.addf %9, %17 : vector<4x128xf32>
    %c0_12 = arith.constant 0 : index
    %c0_13 = arith.constant 0 : index
    %c0_14 = arith.constant 0 : index
    %c2 = arith.constant 2 : index
    %19 = vector.load %arg2[%c0_12, %c0_13, %c0_14, %c2] : memref<1x1x1x130xf32, #tpu.memory_space<vmem>>, vector<1x1x1x128xf32>
    %20 = vector.shape_cast %19 : vector<1x1x1x128xf32> to vector<1x128xf32>
    %c2_15 = arith.constant 2 : index
    %c0_16 = arith.constant 0 : index
    %c0_17 = arith.constant 0 : index
    %21 = vector.load %arg3[%c2_15, %c0_16, %c0_17] : memref<3x4x1xbf16, #tpu.memory_space<vmem>>, vector<1x4x1xbf16>
    %22 = vector.shape_cast %21 : vector<1x4x1xbf16> to vector<4x1xbf16>
    %23 = arith.extf %22 : vector<4x1xbf16> to vector<4x1xf32>
    %24 = vector.broadcast %23 : vector<4x1xf32> to vector<4x128xf32>
    %25 = vector.broadcast %20 : vector<1x128xf32> to vector<4x128xf32>
    %26 = arith.mulf %24, %25 : vector<4x128xf32>
    %27 = arith.addf %18, %26 : vector<4x128xf32>
    %c0_18 = arith.constant 0 : index
    %c0_19 = arith.constant 0 : index
    %28 = vector.load %arg4[%c0_18, %c0_19] : memref<4x1xf32, #tpu.memory_space<vmem>>, vector<4x1xf32>
    %29 = vector.broadcast %28 : vector<4x1xf32> to vector<4x128xf32>
    %30 = arith.addf %27, %29 : vector<4x128xf32>
    %c0_20 = arith.constant 0 : index
    %c0_21 = arith.constant 0 : index
    %c0_22 = arith.constant 0 : index
    %31 = vector.load %arg5[%c0_20, %c0_21, %c0_22] : memref<1x4x128xf32, #tpu.memory_space<vmem>>, vector<1x4x128xf32>
    %32 = vector.shape_cast %31 : vector<1x4x128xf32> to vector<4x128xf32>
    %33 = vector.shape_cast %30 : vector<4x128xf32> to vector<1x4x128xf32>
    tpu.vector_store %arg5[%c0_20, %c0_21, %c0_22], %33 {strides = array<i32>} : memref<1x4x128xf32, #tpu.memory_space<vmem>>, vector<1x4x128xf32>,
    return
  }
  func.func @transform_0(%arg0: i32, %arg1: i32) -> (i32, i32, i32, i32) {
    %c0_i32 = arith.constant 0 : i32
    %c0_i32_0 = arith.constant 0 : i32
    %c0_i32_1 = arith.constant 0 : i32
    %c0_i32_2 = arith.constant 0 : i32
    return %arg1, %c0_i32, %c0_i32_0, %c0_i32_1 : i32, i32, i32, i32
  }
  func.func @transform_1(%arg0: i32, %arg1: i32) -> (i32, i32, i32) {
    %c0_i32 = arith.constant 0 : i32
    %c0_i32_0 = arith.constant 0 : i32
    %c0_i32_1 = arith.constant 0 : i32
    return %c0_i32, %arg0, %c0_i32_0 : i32, i32, i32
  }
  func.func @transform_2(%arg0: i32, %arg1: i32) -> (i32, i32) {
    %c0_i32 = arith.constant 0 : i32
    %c0_i32_0 = arith.constant 0 : i32
    return %arg0, %c0_i32 : i32, i32
  }
  func.func @transform_3(%arg0: i32, %arg1: i32) -> (i32, i32, i32) {
    %c0_i32 = arith.constant 0 : i32
    %c0_i32_0 = arith.constant 0 : i32
    return %arg1, %arg0, %c0_i32 : i32, i32, i32
  }
}

</mosaic_0001>

<bundles_post_ra>
// kernel: tpu_custom_call.1
= control target key start
LH: loop header
LB: loop body
LE: loop exit
PB: predicated region body
PF: predicated region fallthrough
CT: control target
= control target key end

     0   :  { %8 = vsyncpa [#allocation3], 0  ;;  %s736_s0 = inlined_call_operand.vmem [shape: f32[2,1,1,130], index: 0, kind: input, shape index: {}]   ;;  %s737_s1 = inlined_call_operand.vmem [shape: bf16[3,4,1], index: 1, kind: input, shape index: {}]   ;;  %s738_s2 = inlined_call_operand.vmem [shape: f32[4,1], index: 2, kind: input, shape index: {}]   ;;  %s739_s3 = inlined_call_operand.hbm [shape: f32[2,4,128], index: 3, kind: output, shape index: {}]  }
   0x1   :  { %10 = vsyncpa [#allocation3 + $0x1], 0  ;;  %s612_s12 = smov 0   ;;  %s614_s13 = smov 0  }
   0x2   :  { %s616_s14 = smov 0   ;;  %s618_s15 = smov 0  }
   0x3   :  { %s620_s16 = smov 0   ;;  %s622_s17 = smov 0  }
   0x4 LB: > { %s426_s18 = sadd.s32 4294967295, %s585_s17   ;;  %s427_s19 = sadd.s32 4294967294, %s585_s17   ;;  %s585_s17 = sphi %s622_s17, %s16_s17   ;;  %s581_s16 = sphi %s620_s16, %s746_s16   ;;  %s577_s15 = sphi %s618_s15, %s745_s15   ;;  %s573_s14 = sphi %s616_s14, %s744_s14   ;;  %s569_s13 = sphi %s614_s13, %s743_s13   ;;  %s565_s12 = sphi %s612_s12, %s742_s12  }
   0x5   : > { %s25_s20 = sadd.s32 1, %s581_s16  ;;  %s115_s21 = sadd.s32 1, %s573_s14 }
   0x6   : > { %p26_p0 = scmp.ge.s32.totalorder %s25_s20, 2  ;;  %p125_p1 = scmp.ne.s32.totalorder %s573_s14, %s569_s13 }
   0x7   : > { %p126_p2 = scmp.eq.s32.totalorder %s426_s18, 1  ;;  %p131_p3 = scmp.ne.s32.totalorder %s569_s13, %s565_s12 }
   0x8   : > { %s748_s20 = smov (%p26_p0, %s25_s20), 0  ;;  %p132_p5 = scmp.eq.s32.totalorder %s427_s19, 1 }
   0x9   : > { %p652_p4 = por %p126_p2, %p125_p1  ;;  %s110_s23 = ssub.s32 %s581_s16, %s748_s20 }
   0xa   : > { %p432_p6 = scmp.ge.s32.totalorder %s585_s17, 1  ;;  %p113_p7 = scmp.eq.s32.totalorder %s110_s23, 0 }
   0xb   : > { %p659_p8 = por %p132_p5, %p131_p3  ;;  %p171_p9 = scmp.lt.s32.totalorder %s585_s17, 3 }
   0xc   : > { %s665_s25 = scalar_select %p113_p7, %s573_s14, %s115_s21  }
   0xd   : > { %p172_p10 = pnand %p432_p6, %p171_p9 }
   0xe   : > { %v215_v0 = vld [vmem:[%s737_s1] sm:$0x3] (!%p172_p10)  ;;  %v436_v1 = vld [vmem:[%s737_s1 + $0x2] sm:$0x3] (!%p172_p10)  ;;  %p202_p11 = scmp.lt.s32.totalorder (!%p172_p10), %s577_s15, 1  ;;  %v225_v2 = vlaneseq (!%p172_p10)  ;;  %v587_v3 = vmov (!%p172_p10), 0  }
   0xf   : > { %175 = sbr.rel (%p172_p10) target bundleno = 173 (0xad), region = 32  ;;  %501 = vset.pattern.permute.xlu0 (!%p172_p10), %v587_v3  ;;  %v216_v4 = vunpack.c.l.bf16 (!%p172_p10), %v215_v0  ;;  %v240_v5 = vunpack.c.l.bf16 (!%p172_p10), %v436_v1  ;;  %v437_v6 = vld [vmem:[%s737_s1 + $0x4] sm:$0x3] (!%p172_p10)  ;;  %v305_v19 = vld [vmem:[%s738_s2] sm:$0xf] (!%p172_p10)  ;;  %s588_s18 = smov (!%p172_p10), 127  }
  0x10   : > { %v226_v7 = vshrl.u32 (!%p172_p10), %v225_v2, 7  ;;  %v274_v11 = vunpack.c.l.bf16 (!%p172_p10), %v437_v6  ;;  %s589_s19 = smov (!%p172_p10), 126   ;;  %v590_v21 = vmov (!%p172_p10), 839922192   ;;  %s199_s21 = sand.u32 (!%p172_p10), 1, %s569_s13   ;;  %vm266_vm0 = vcmask (!%p172_p10), 1039360  }
  0x11   : > { %v502_v8 = vpack.i.bf16 (!%p172_p10), %v240_v5, %v216_v4  ;;  %v223_v22 = vunpack.c.l.s4 (!%p172_p10), %v590_v21  ;;  %s433_s23 = sshll.u32 (!%p172_p10), %s199_s21, 2  ;;  %vm300_vm1 = vcmask (!%p172_p10), 1031168   ;;  %s439_s26 = sshll.u32 (!%p172_p10), %s577_s15, 6 }
  0x12   : > { %v256_v9 = vsub.s32 (!%p172_p10), 0, %v226_v7  ;;  %v260_v10 = vsub.s32 (!%p172_p10), 1, %v226_v7  ;;  %s201_s27 = scalar_lea.vmem (!%p172_p10), [#allocation2], %s433_s23  ;;  %s689_s4 = scalar_lea.hbm (!%p172_p10), %s739_s3, %s439_s26 }
  0x13   : > { %503 = vperm.xlu0 (!%p172_p10), %501, %v502_v8   ;;  %v224_v24 = vunpack.c.0.s8 (!%p172_p10), %v223_v22  ;;  %s328_s28 = sshll.u32 (!%p172_p10), %s201_s27, 4  ;;  %s691_s28 = int_to_ptr.vmem [resolvable:$true] %s328_s28 }
  0x15   : > { %v227_v25 = vsub.s32 (!%p172_p10), %v224_v24, %v226_v7 }
  0x16   : > { %s203_s5 = scalar_select %p202_p11, %s577_s15, 1 }
  0x17   : > { %277 = vperm.xlu0 %501, %v274_v11   ;;  %s591_s15 = smov [#allocation2]  }
  0x18   : > { %s434_s6 = sshll.u32 %s203_s5, 1  ;;  %s314_s5 = scalar_lea.sflag [#allocation3], %s199_s21 }
  0x19   : > { %s205_s9 = scalar_lea.vmem %s736_s0, %s434_s6  ;;  %s507_s6 = scalar_lea.vmem %s691_s28, 64 }
  0x1a   : > { %v237_v12 = vld [vmem:[%s205_s9] sm:$0x3]  ;;  %p508_p12 = scmp.ne.s32.totalorder %s691_s28, %s507_s6  ;;  %s511_s7 = sshll.u32 %s591_s15, 4  ;;  %s512_s7 = int_to_ptr.vmem [resolvable:$false] %s511_s7 }
  0x1b   : > { %v271_v13 = vld [vmem:[%s205_s9] sm:$0x3]  ;;  %v257_v14 = vrot.slane %v237_v12, %v256_v9  ;;  %v261_v15 = vrot.slane %v237_v12, %v260_v10  ;;  %308 = vperm.xlu0 %501, %v305_v19   ;;  %s513_s8 = scalar_lea.vmem %s512_s7, 128  ;;  %p514_p1 = scmp.lt.s32.totalorder %s691_s28, %s512_s7 }
  0x1c   : > { %v291_v16 = vrot.slane %v271_v13, %v256_v9  ;;  %v295_v17 = vrot.slane %v271_v13, %v260_v10  ;;  %v435_v31 = vld [vmem:[%s205_s9] ss:$0 sm:$0xff]  ;;  %p509_p13 = pnand %p508_p12, %p652_p4  ;;  %p515_p2 = scmp.lt.s32.totalorder %s513_s8, %s507_s6 }
  0x1d   : > { %v262_v18 = vcombine.low %v257_v14, %v261_v15 }
  0x1e   : > { %v296_v20 = vcombine.low %v291_v16, %v295_v17  ;;  %p510_p0 = pneg %p509_p13  ;;  %p516_p3 = por %p515_p2, %p514_p1 }
  0x1f   : > { %263 = vrot.lane.b32.xlu1 %v262_v18, %s588_s18 }
  0x20   : > { %p517_p5 = pnand %p516_p3, %p510_p0 }
  0x23   : > { %297 = vrot.lane.b32.xlu1 %v296_v20, %s589_s19 }
  0x91   : > { %v264_v23 = vpop.permute.xlu1 %263 }
  0x92   : > { %v265_v27 = vrot.slane %v264_v23, 4  ;;  %v504_v28 = vpop.permute.xlu0 %503 }
  0x93   : > { %v506_v29 = vunpack.i.h.bf16 %v504_v28  ;;  %v505_v30 = vunpack.i.l.bf16 %v504_v28 }
  0x94   : > { %v267_v35 = vsel %vm266_vm0, %v264_v23, %v265_v27 }
  0x95   : > { %v298_v26 = vpop.permute.xlu1 %297  ;;  %v252_v33 = vrot.slane %v506_v29, %v227_v25  ;;  %v228_v34 = vrot.slane %v505_v30, %v227_v25 }
  0x96   : > { %v299_v32 = vrot.slane %v298_v26, 4  ;;  %v278_v36 = vpop.permute.xlu0 %277 }
  0x97   : > { %v235_v37 = vmul.f32 %v435_v31, %v228_v34  ;;  %v269_v38 = vmul.f32 %v267_v35, %v252_v33  ;;  %v286_v39 = vrot.slane %v278_v36, %v227_v25 }
  0x98   : > { %v301_v40 = vsel %vm300_vm1, %v298_v26, %v299_v32 }
  0x99   : > { %v303_v41 = vmul.f32 %v301_v40, %v286_v39  ;;  %v270_v42 = vadd.f32 %v269_v38, %v235_v37 }
  0x9a   : > { %v309_v44 = vpop.permute.xlu0 %308 }
  0x9b   : > { %v304_v43 = vadd.f32 %v303_v41, %v270_v42 }
  0x9d   : > { %v311_v45 = vadd.f32 %v309_v44, %v304_v43 }
  0x9f   : > { %312 = vst [vmem:[%s201_s27] sm:$0xf] %v311_v45 }
  0xa0   : > { %520 = shalt.err (!%p517_p5)
}
  0xa1   : > { %s521_s9 = scalar_lea.hbm %s689_s4, 64  ;;  %s525_s18 = scalar_lea.hbm %s739_s3, 128 }
  0xa2   : > { %p522_p6 = scmp.ne.s32.totalorder %s689_s4, %s521_s9  ;;  %p526_p10 = scmp.lt.u32.totalorder %s689_s4, %s739_s3 }
  0xa3   : > { %p527_p11 = scmp.lt.u32.totalorder %s525_s18, %s521_s9  ;;  %p529_p13 = scmp.lt.u32.totalorder %s521_s9, %s689_s4 }
  0xa4   : > { %p523_p7 = pnand %p522_p6, %p652_p4 }
  0xa5   : > { %p528_p12 = por %p527_p11, %p526_p10 }
  0xa6   : > { %p524_p9 = pneg %p523_p7 }
  0xa7   : > { %p530_p0 = por %p529_p13, %p528_p12 }
  0xa9   : > { %p531_p1 = pnand %p530_p0, %p524_p9 }
  0xab   : > { %534 = shalt.err (!%p531_p1)
}
  0xac   : > { %442 = dma.vmem_to_hbm [thread:$0]  (%p652_p4), %s691_s28, 64, %s689_s4, %s314_s5  }
  0xad PF: > { %p448_p2 = scmp.ge.s32.totalorder %s585_s17, 2  ;;  %s340_s23 = sand.u32 1, %s565_s12  }
  0xae   : > { %s341_s26 = scalar_lea.sflag [#allocation3], %s340_s23 }
  0xaf   : > { %p445_p3 = pnand %p448_p2, %p659_p8 }
  0xb1   : > { %560 = dma.done.wait (!%p445_p3), %s341_s26, 64  }
  0xb2   : > { %562 = vsyncadd (!%p445_p3), %s341_s26, 4294967232  ;;  %s16_s17 = sadd.s32 1, %s585_s17   ;;  %s742_s12 = smov %s569_s13 }
  0xb3   : > { %p13_p5 = scmp.ge.s32.totalorder %s16_s17, 4   ;;  %s743_s13 = smov %s573_s14 }
  0xb4   : > { %s744_s14 = smov %s665_s25  ;;  %s745_s15 = smov %s581_s16 }
  0xb5   : > { %s746_s16 = smov %s748_s20  ;;  %15 = sbr.rel (!%p13_p5) target bundleno = 4 (0x4), region = 75 }
  0xbc   :  { %346 = vsyncpa [#allocation3], 1 }
  0xbd   :  { %348 = vsyncpa [#allocation3 + $0x1], 1 }

</bundles_post_ra>
